<compile_context>
chip_gen: v5e
topology: v5e:2x2
jax: 0.10.0
libtpu: 0.0.40
codegen_flags: <defaults>
</compile_context>

<pallas_src>
import functools

import jax
import jax.numpy as jnp
import numpy as np
from jax.experimental import pallas as pl
from jax.experimental.pallas import tpu as pltpu


# --------------------------------------------------------------------------
# Geometry helpers (trace-time Python, mirrors the torch reference exactly)
# --------------------------------------------------------------------------
def _setup_size(size):
    if isinstance(size, (int, float)):
        return (int(size), int(size))
    if len(size) == 1:
        return (int(size[0]), int(size[0]))
    if len(size) != 2:
        raise ValueError("Please provide only two dimensions (h, w) for size.")
    return (int(size[0]), int(size[1]))


def _scalar_fill(fill):
    if isinstance(fill, (tuple, list)):
        if len(fill) == 1:
            return fill[0]
        raise ValueError("Only scalar fill is supported for array inputs.")
    return fill


def _crop_pad_geometry(in_h, in_w, out_h, out_w):
    """Replicates center_crop_or_pad offset math exactly (pad then crop)."""
    pad_left = (out_w - in_w) // 2 if out_w > in_w else 0
    pad_top = (out_h - in_h) // 2 if out_h > in_h else 0
    pad_right = (out_w - in_w + 1) // 2 if out_w > in_w else 0
    pad_bottom = (out_h - in_h + 1) // 2 if out_h > in_h else 0

    padded_h = in_h + pad_top + pad_bottom
    padded_w = in_w + pad_left + pad_right

    # torch: int(round(...)) — same Python round semantics
    crop_top = int(round((padded_h - out_h) / 2.0))
    crop_left = int(round((padded_w - out_w) / 2.0))

    # out[y, x] = input[y + off_h, x + off_w] if in range else fill
    off_h = crop_top - pad_top
    off_w = crop_left - pad_left

    src_h0 = max(0, off_h)
    src_h1 = min(in_h, off_h + out_h)
    src_w0 = max(0, off_w)
    src_w1 = min(in_w, off_w + out_w)

    dst_h0 = src_h0 - off_h
    dst_w0 = src_w0 - off_w
    hh = max(0, src_h1 - src_h0)
    ww = max(0, src_w1 - src_w0)
    return (src_h0, src_w0, dst_h0, dst_w0, hh, ww)


# --------------------------------------------------------------------------
# VMEM sizing helpers (generation-aware)
# --------------------------------------------------------------------------
def _vmem_capacity_bytes(default=64 * 1024 * 1024):
    try:
        info = pltpu.get_tpu_info()
        cap = getattr(info, "vmem_capacity_bytes", None)
        return int(cap) if cap else default
    except Exception:  # pragma: no cover - conservative fallback
        return default


def _ceil_to(x, m):
    return ((x + m - 1) // m) * m


def _padded_vmem_bytes(shape, dtype):
    """Bytes of a VMEM buffer including (8*pack, 128) tile padding."""
    itemsize = jnp.dtype(dtype).itemsize
    pack = max(1, 4 // max(itemsize, 1))  # sub-32-bit packs along sublanes
    *lead, h, w = shape
    lead_n = 1
    for d in lead:
        lead_n *= int(d)
    return lead_n * _ceil_to(max(h, 1), 8 * pack) * _ceil_to(max(w, 1), 128) * itemsize


def _pick_batch_tile(num_planes, per_plane_bytes, budget):
    bl = max(1, min(num_planes, budget // max(per_plane_bytes, 1)))
    # Keep >=4 grid steps when possible so each v7x TensorCore gets >=2 steps
    # (per-core double buffering); negligible overhead on single-core parts.
    if num_planes >= 4:
        bl = min(bl, max(1, num_planes // 4))
    elif num_planes >= 2:
        bl = min(bl, max(1, num_planes // 2))
    return int(bl)


# --------------------------------------------------------------------------
# Kernel
# --------------------------------------------------------------------------
def _center_crop_or_pad_kernel(x_hbm, o_ref, win_ref, sem, *, geom, fill,
                               bl, bl_tail, steps):
    src_h0, src_w0, dst_h0, dst_w0, hh, ww = geom
    _, out_h, out_w = o_ref.shape
    dt = o_ref.dtype
    i = pl.program_id(0)
    bot = dst_h0 + hh
    right = dst_w0 + ww

    # ---- Fill only the pad border strips (static geometry). For a ragged
    # tail block the rows past the valid range are discarded on writeback. --
    if dst_h0 > 0:  # top strip, full width
        o_ref[:, 0:dst_h0, :] = jnp.full((bl, dst_h0, out_w), fill, dt)
    if bot < out_h:  # bottom strip, full width
        o_ref[:, bot:out_h, :] = jnp.full((bl, out_h - bot, out_w), fill, dt)
    if dst_w0 > 0:  # left strip, middle rows only
        o_ref[:, dst_h0:bot, 0:dst_w0] = jnp.full((bl, hh, dst_w0), fill, dt)
    if right < out_w:  # right strip, middle rows only
        o_ref[:, dst_h0:bot, right:out_w] = jnp.full(
            (bl, hh, out_w - right), fill, dt)

    b0 = i * bl

    def copy_rows(rows):
        # Windowed DMA: read only the overlap window from HBM (static H/W
        # offsets, dynamic batch offset) into a tile-aligned staging buffer.
        cp = pltpu.make_async_copy(
            x_hbm.at[pl.ds(b0, rows),
                     src_h0:src_h0 + hh,
                     src_w0:src_w0 + ww],
            win_ref.at[0:rows],
            sem,
        )
        cp.start()
        cp.wait()
        # Write the overlap window into the output block exactly once.
        o_ref[0:rows, dst_h0:bot, dst_w0:right] = win_ref[0:rows]

    if bl_tail == bl:
        # Grid divides evenly: single static path.
        copy_rows(bl)
    else:
        @pl.when(i < steps - 1)
        def _():
            copy_rows(bl)

        @pl.when(i == steps - 1)
        def _():
            copy_rows(bl_tail)  # statically-sized ragged tail


# --------------------------------------------------------------------------
# Wrapper
# --------------------------------------------------------------------------
def center_crop_or_pad(img: jax.Array, size, fill=0) -> jax.Array:
    """img: [..., H, W]. Returns [..., out_h, out_w] with the same dtype."""
    out_h, out_w = _setup_size(size)
    *lead, in_h, in_w = img.shape
    fill = _scalar_fill(fill)

    # Identity geometry: skip the kernel (and the full HBM read+write).
    if (out_h, out_w) == (in_h, in_w):
        return img

    geom = _crop_pad_geometry(in_h, in_w, out_h, out_w)
    src_h0, src_w0, dst_h0, dst_w0, hh, ww = geom

    out_shape = tuple(lead) + (out_h, out_w)
    num_planes = 1
    for d in lead:
        num_planes *= int(d)

    # No overlap is only possible for zero-sized inputs: pure fill.
    if hh <= 0 or ww <= 0 or num_planes == 0:
        return jnp.full(out_shape, fill, dtype=img.dtype)

    dtype = img.dtype
    itemsize = jnp.dtype(dtype).itemsize
    x3 = img.reshape((num_planes, in_h, in_w))  # merge leading dims (free)

    vmem_cap = _vmem_capacity_bytes()
    budget = max(8 << 20, vmem_cap // 2)  # ~32 MiB on v7x, ~64 MiB on v5e/v6e

    # Live VMEM per plane: double-buffered output block + window staging.
    per_plane = (2 * _padded_vmem_bytes((1, out_h, out_w), dtype)
                 + _padded_vmem_bytes((1, hh, ww), dtype))
    bl = _pick_batch_tile(num_planes, per_plane, budget)
    # TODO(synk): if a single (out + window) plane exceeds `budget` (very large
    # H*W), tile the grid over output rows instead of relying on bl=1 fitting.

    steps = pl.cdiv(num_planes, bl)
    bl_tail = num_planes - (steps - 1) * bl

    need = bl * per_plane
    vmem_limit = int(min(vmem_cap * 7 // 8, max(32 << 20, need + (8 << 20))))

    # Window-only read bytes + output write bytes (accurate for XLA overlap).
    bytes_accessed = num_planes * (hh * ww + out_h * out_w) * itemsize

    kernel = functools.partial(
        _center_crop_or_pad_kernel, geom=geom, fill=fill,
        bl=bl, bl_tail=bl_tail, steps=steps)

    out3 = pl.pallas_call(
        kernel,
        out_shape=jax.ShapeDtypeStruct((num_planes, out_h, out_w), dtype),
        grid_spec=pltpu.PrefetchScalarGridSpec(
            num_scalar_prefetch=0,
            grid=(steps,),
            in_specs=[
                # Raw HBM ref: only the overlap window is DMA'd in-kernel.
                pl.BlockSpec(memory_space=pl.ANY),
            ],
            out_specs=pl.BlockSpec((bl, out_h, out_w), lambda i: (i, 0, 0)),
            scratch_shapes=[
                pltpu.VMEM((bl, hh, ww), dtype),  # window staging buffer
                pltpu.SemaphoreType.DMA,
            ],
        ),
        compiler_params=pltpu.CompilerParams(
            dimension_semantics=("parallel",),
            vmem_limit_bytes=vmem_limit,
        ),
        cost_estimate=pl.CostEstimate(
            flops=0, transcendentals=0, bytes_accessed=bytes_accessed),
    )(x3)
    return out3.reshape(out_shape)


class CenterCropOrPad:
    """JAX/Pallas port of open_clip CenterCropOrPad (no learnable params)."""

    def __init__(self, size, fill=0):
        self.size = _setup_size(size)
        self.fill = fill

    def __call__(self, img: jax.Array) -> jax.Array:
        return center_crop_or_pad(img, self.size, fill=self.fill)

    def __repr__(self):
        return f"{self.__class__.__name__}(size={self.size})"


# --------------------------------------------------------------------------
# Reference + tests
# --------------------------------------------------------------------------
def _reference_numpy(x, size, fill=0):
    out_h, out_w = _setup_size(size)
    in_h, in_w = x.shape[-2:]
    src_h0, src_w0, dst_h0, dst_w0, hh, ww = _crop_pad_geometry(
        in_h, in_w, out_h, out_w)
    out = np.full(x.shape[:-2] + (out_h, out_w), fill, dtype=x.dtype)
    if hh > 0 and ww > 0:
        out[..., dst_h0:dst_h0 + hh, dst_w0:dst_w0 + ww] = (
            x[..., src_h0:src_h0 + hh, src_w0:src_w0 + ww])
    return out


if __name__ == "__main__":
    key = jax.random.PRNGKey(0)
    # Small deterministic input, NCHW.
    x = jax.random.normal(key, (2, 4, 16, 16), dtype=jnp.float32)
    x_np = np.asarray(x)

    # 1) Mixed: crop along H (16 -> 12), pad along W (16 -> 20).
    out = jax.block_until_ready(CenterCropOrPad(size=(12, 20), fill=0)(x))
    ref = _reference_numpy(x_np, (12, 20), fill=0)
    np.testing.assert_allclose(np.asarray(out), ref, rtol=0, atol=0)

    # 2) Pure crop (square, smaller than input) — window-only HBM read.
    out2 = jax.block_until_ready(CenterCropOrPad(8)(x))
    ref2 = _reference_numpy(x_np, 8, fill=0)
    np.testing.assert_allclose(np.asarray(out2), ref2, rtol=0, atol=0)

    # 3) Pure pad (both dims larger), non-zero fill.
    out3 = jax.block_until_ready(CenterCropOrPad((20, 24), fill=1.5)(x))
    ref3 = _reference_numpy(x_np, (20, 24), fill=1.5)
    np.testing.assert_allclose(np.asarray(out3), ref3, rtol=0, atol=0)

    # 4) Ragged batch tail: L = 9*3 = 27 planes -> bl=6, 5 grid steps, tail=3.
    x9 = jax.random.normal(jax.random.PRNGKey(0), (9, 3, 16, 16),
                           dtype=jnp.float32)
    out4 = jax.block_until_ready(CenterCropOrPad((10, 18))(x9))
    ref4 = _reference_numpy(np.asarray(x9), (10, 18), fill=0)
    np.testing.assert_allclose(np.asarray(out4), ref4, rtol=0, atol=0)

    # 5) Identity geometry short-circuit.
    out5 = jax.block_until_ready(CenterCropOrPad((16, 16))(x))
    np.testing.assert_allclose(np.asarray(out5), x_np, rtol=0, atol=0)

    # 6) Packed dtype (bf16): exercises sublane-packed DMA + strided stores.
    x_bf = x.astype(jnp.bfloat16)
    out6 = jax.block_until_ready(CenterCropOrPad((12, 20))(x_bf))
    ref6 = _reference_numpy(np.asarray(x_bf).astype(np.float32), (12, 20), 0)
    np.testing.assert_allclose(
        np.asarray(out6).astype(np.float32), ref6, rtol=0, atol=0)

    print("KERNEL_OK")
</pallas_src>

<mosaic_0001>
module attributes {stable_mosaic.version = 11 : i64} {
  func.func @_center_crop_or_pad_kernel(%arg0: i32, %arg1: memref<8x16x16xf32, #tpu.memory_space<any>>, %arg2: memref<2x12x20xf32, #tpu.memory_space<vmem>>, %arg3: memref<2x12x16xf32, #tpu.memory_space<vmem>>, %arg4: memref<!tpu.dma_semaphore, #tpu.memory_space<semaphore_mem>>) attributes {dimension_semantics = [#tpu.dimension_semantics<parallel>], iteration_bounds = array<i64: 4>, scalar_prefetch = 0 : i64, scratch_operands = 2 : i64, tpu.core_type = #tpu.core_type<tc>, window_params = [{}, {transform_indices = @transform_1, window_bounds = array<i64: 2, 12, 20>}]} {
    %cst = arith.constant 0.000000e+00 : f32
    %0 = vector.broadcast %cst : f32 to vector<2x12x2xf32>
    %c0 = arith.constant 0 : index
    %c0_0 = arith.constant 0 : index
    %c0_1 = arith.constant 0 : index
    %1 = vector.load %arg2[%c0, %c0_0, %c0_1] : memref<2x12x20xf32, #tpu.memory_space<vmem>>, vector<2x12x2xf32>
    tpu.vector_store %arg2[%c0, %c0_0, %c0_1], %0 {strides = array<i32>} : memref<2x12x20xf32, #tpu.memory_space<vmem>>, vector<2x12x2xf32>,
    %cst_2 = arith.constant 0.000000e+00 : f32
    %2 = vector.broadcast %cst_2 : f32 to vector<2x12x2xf32>
    %c0_3 = arith.constant 0 : index
    %c0_4 = arith.constant 0 : index
    %c18 = arith.constant 18 : index
    %3 = vector.load %arg2[%c0_3, %c0_4, %c18] : memref<2x12x20xf32, #tpu.memory_space<vmem>>, vector<2x12x2xf32>
    tpu.vector_store %arg2[%c0_3, %c0_4, %c18], %2 {strides = array<i32>} : memref<2x12x20xf32, #tpu.memory_space<vmem>>, vector<2x12x2xf32>,
    %c2_i32 = arith.constant 2 : i32
    %4 = arith.muli %arg0, %c2_i32 : i32
    %c2_i32_5 = arith.constant 2 : i32
    %c0_i32 = arith.constant 0 : i32
    %5 = tpu.memref_slice %arg1[%4, %c2_i32_5, %c0_i32] : memref<8x16x16xf32, #tpu.memory_space<any>> -> memref<2x12x16xf32, #tpu.memory_space<any>>
    %c0_i32_6 = arith.constant 0 : i32
    %c0_i32_7 = arith.constant 0 : i32
    %c0_i32_8 = arith.constant 0 : i32
    %6 = tpu.memref_slice %arg3[%c0_i32_6, %c0_i32_7, %c0_i32_8] : memref<2x12x16xf32, #tpu.memory_space<vmem>> -> memref<2x12x16xf32, #tpu.memory_space<vmem>>
    tpu.enqueue_dma source(%5 : memref<2x12x16xf32, #tpu.memory_space<any>>) target(%6 : memref<2x12x16xf32, #tpu.memory_space<vmem>>) target_semaphore(%arg4 : memref<!tpu.dma_semaphore, #tpu.memory_space<semaphore_mem>>)
    %c2_i32_9 = arith.constant 2 : i32
    %c0_i32_10 = arith.constant 0 : i32
    %7 = tpu.memref_slice %arg1[%4, %c2_i32_9, %c0_i32_10] : memref<8x16x16xf32, #tpu.memory_space<any>> -> memref<2x12x16xf32, #tpu.memory_space<any>>
    %c0_i32_11 = arith.constant 0 : i32
    %c0_i32_12 = arith.constant 0 : i32
    %c0_i32_13 = arith.constant 0 : i32
    %8 = tpu.memref_slice %arg3[%c0_i32_11, %c0_i32_12, %c0_i32_13] : memref<2x12x16xf32, #tpu.memory_space<vmem>> -> memref<2x12x16xf32, #tpu.memory_space<vmem>>
    tpu.wait_dma2 semaphore(%arg4 : memref<!tpu.dma_semaphore, #tpu.memory_space<semaphore_mem>>) src(%7 : memref<2x12x16xf32, #tpu.memory_space<any>>) dst(%8 : memref<2x12x16xf32, #tpu.memory_space<vmem>>)
    %c0_14 = arith.constant 0 : index
    %c0_15 = arith.constant 0 : index
    %c0_16 = arith.constant 0 : index
    %9 = vector.load %arg3[%c0_14, %c0_15, %c0_16] : memref<2x12x16xf32, #tpu.memory_space<vmem>>, vector<2x12x16xf32>
    %c0_17 = arith.constant 0 : index
    %c0_18 = arith.constant 0 : index
    %c2 = arith.constant 2 : index
    %10 = vector.load %arg2[%c0_17, %c0_18, %c2] : memref<2x12x20xf32, #tpu.memory_space<vmem>>, vector<2x12x16xf32>
    tpu.vector_store %arg2[%c0_17, %c0_18, %c2], %9 {strides = array<i32>} : memref<2x12x20xf32, #tpu.memory_space<vmem>>, vector<2x12x16xf32>,
    return
  }
  func.func @transform_1(%arg0: i32) -> (i32, i32, i32) {
    %c0_i32 = arith.constant 0 : i32
    %c0_i32_0 = arith.constant 0 : i32
    %c0_i32_1 = arith.constant 0 : i32
    return %arg0, %c0_i32, %c0_i32_0 : i32, i32, i32
  }
}

</mosaic_0001>

<bundles_post_ra>
// kernel: tpu_custom_call.1
= control target key start
LH: loop header
LB: loop body
LE: loop exit
PB: predicated region body
PF: predicated region fallthrough
CT: control target
= control target key end

     0   :  { %s231_s6 = smov 0   ;;  %s268_s0 = inlined_call_operand.hbm [shape: f32[8,16,16], index: 0, kind: input, shape index: {}]   ;;  %s269_s1 = inlined_call_operand.vmem [shape: f32[8,12,20], index: 1, kind: output, shape index: {}]  }
   0x1 LB: > { %p160_p0 = scmp.ge.s32.totalorder %s214_s6, 4  ;;  %s214_s6 = sphi %s231_s6, %s11_s6  }
   0x2   : > { %s161_s7 = sshll.u32 (!%p160_p0), %s214_s6, 1  ;;  %s164_s8 = sshll.u32 (!%p160_p0), %s214_s6, 5 }
   0x3   : > { %36 = sbr.rel (%p160_p0) target bundleno = 149 (0x95), region = 12  ;;  %p46_p1 = scmp.lt.s32.totalorder (!%p160_p0), %s161_s7, 7 }
   0x4   : > { %s141_s11 = scalar_lea.hbm (!%p160_p0), %s268_s0, %s164_s8  ;;  %s217_s18 = smov (!%p160_p0), [#allocation2]  }
   0x5   : > { %s142_s12 = scalar_lea.hbm (!%p160_p0), %s141_s11, 2  ;;  %s70_s19 = sshll.u32 (!%p160_p0), %s217_s18, 4  ;;  %s71_s19 = int_to_ptr.vmem [resolvable:$true] %s70_s19 }
   0x6   : > { %s68_s17 = sshll.u32 (!%p160_p0), %s142_s12, 4  ;;  %s186_s24 = scalar_lea.hbm (!%p160_p0), %s268_s0, 128  ;;  %s69_s17 = int_to_ptr.hbm [resolvable:$true] %s68_s17 }
   0x7   : > { %s182_s20 = sshra.s32 (!%p160_p0), %s69_s17, 4  ;;  %s183_s20 = int_to_ptr.hbm [resolvable:$true] %s182_s20 }
   0x8   : > { %s271_s7 = smov (!%p46_p1, %s161_s7), 7  ;;  %vm52_vm0 = vcmask 15360   ;;  %vm54_vm1 = vcmask 11264   ;;  %v216_v0 = vmov 0.0   ;;  %vm58_vm2 = vcmask 162960   ;;  %s184_s21 = scalar_lea.hbm %s183_s20, 24 }
   0x9   : > { %s168_s13 = sshll.u32 %s271_s7, 4  ;;  %vm60_vm3 = vcmask 158864   ;;  %p185_p2 = scmp.ne.s32.totalorder %s183_s20, %s184_s21 }
   0xa   : > { %s245_s16 = scalar_lea.vmem %s269_s1, %s168_s13  ;;  %p187_p3 = scmp.lt.s32.totalorder %s183_s20, %s268_s0 }
   0xb   : > { %53 = vst.msk [vmem:[%s245_s16] sm:$0xff] %vm52_vm0, %v216_v0  ;;  %p188_p4 = scmp.lt.s32.totalorder %s186_s24, %s184_s21 }
   0xc   : > { %56 = vst.msk [vmem:[%s245_s16 + $0x10] sm:$0xff] %vm52_vm0, %v216_v0 }
   0xd   : > { %55 = vst.msk [vmem:[%s245_s16 + $0x8] sm:$0xf] %vm54_vm1, %v216_v0  ;;  %p189_p5 = por %p188_p4, %p187_p3 }
   0xe   : > { %57 = vst.msk [vmem:[%s245_s16 + $0x18] sm:$0xf] %vm54_vm1, %v216_v0 }
   0xf   : > { %59 = vst.msk [vmem:[%s245_s16] sm:$0xff] %vm58_vm2, %v216_v0  ;;  %p190_p6 = pnand %p189_p5, %p185_p2 }
  0x10   : > { %62 = vst.msk [vmem:[%s245_s16 + $0x10] sm:$0xff] %vm58_vm2, %v216_v0 }
  0x11   : > { %61 = vst.msk [vmem:[%s245_s16 + $0x8] sm:$0xf] %vm60_vm3, %v216_v0 }
  0x12   : > { %63 = vst.msk [vmem:[%s245_s16 + $0x18] sm:$0xf] %vm60_vm3, %v216_v0 }
  0x13   : > { %193 = shalt.err (!%p190_p6)  }
  0x14   : > { %s218_s27 = smov 256   ;;  %s219_s28 = smov 12  }
  0x15   : > { %75 = dma.hbm_to_vmem [thread:$0]  %s69_s17, 384, %s71_s19, [#allocation3], %s218_s27, %s218_s27, %s219_s28 }
  0x16   : > { %210 = dma.done.wait [#allocation3], 384 }
  0x17   : > { %211 = vsyncadd [#allocation3], 4294966912  ;;  %v80_v1 = vld [vmem:[#allocation2] sm:$0xff]  ;;  %v82_v2 = vld [vmem:[#allocation2 + $0x10] sm:$0xff]  ;;  %s220_s29 = smov 2   ;;  %vm100_vm4 = vcmask 146448  }
  0x18   : > { %88 = vrot.lane.b32.xlu0 %v80_v1, %s220_s29  ;;  %92 = vrot.lane.b32.xlu1 %v82_v2, %s220_s29  ;;  %v81_v3 = vld [vmem:[#allocation2 + $0x8] sm:$0xf]  ;;  %v83_v4 = vld [vmem:[#allocation2 + $0x18] sm:$0xf]  ;;  %vm102_vm5 = vcmask 142352  }
  0x20   : > { %90 = vrot.lane.b32.xlu0 %v81_v3, %s220_s29  ;;  %94 = vrot.lane.b32.xlu1 %v83_v4, %s220_s29 }
  0x8a   : > { %v89_v5 = vpop.permute.xlu0 %88  ;;  %v93_v6 = vpop.permute.xlu1 %92 }
  0x8b   : > { %101 = vst.msk [vmem:[%s245_s16] sm:$0xff] %vm100_vm4, %v89_v5 }
  0x8c   : > { %104 = vst.msk [vmem:[%s245_s16 + $0x10] sm:$0xff] %vm100_vm4, %v93_v6 }
  0x92   : > { %v91_v7 = vpop.permute.xlu0 %90  ;;  %v95_v8 = vpop.permute.xlu1 %94 }
  0x93   : > { %103 = vst.msk [vmem:[%s245_s16 + $0x8] sm:$0xf] %vm102_vm5, %v91_v7 }
  0x94   : > { %105 = vst.msk [vmem:[%s245_s16 + $0x18] sm:$0xf] %vm102_vm5, %v95_v8 }
  0x95 PF: > { %s11_s6 = sadd.s32 1, %s214_s6  }
  0x96   : > { %p8_p7 = scmp.ge.s32.totalorder %s11_s6, 5  }
  0x98   :  { %10 = sbr.rel (!%p8_p7) target bundleno = 1 (0x1), region = 40 }
  0x9d   :  { %130 = vsyncmov [#allocation3] }
  0xa0   :  { %s131_s30 = vpop.sfrf %130 }
  0xa1   :  { %p167_p8 = scmp.ne.s32.totalorder %s131_s30, 0 }
  0xa3   :  { %135 = shalt.err (%p167_p8)  }

</bundles_post_ra>
